<compile_context>
chip_gen: v5e
topology: v5e:2x2
jax: 0.10.0
libtpu: 0.0.40
codegen_flags: <defaults>
</compile_context>

<pallas_src>
import functools

import jax
import jax.numpy as jnp
from jax.experimental import pallas as pl
from jax.experimental.pallas import tpu as pltpu


def _channel_attention_kernel(x_ref, w1t_ref, w2_ref, o_ref,
                              sum_acc, max_acc, *, inv_hw):
    # x_ref    : (1, C, TS)   f32  -- one batch element, one spatial tile (lane axis = spatial)
    # w1t_ref  : (C, Cmid)    f32  -- W1^T  (W1 is Conv2d(C, Cmid, 1).weight squeezed)
    # w2_ref   : (C, Cmid)    f32  -- W2    (Conv2d(Cmid, C, 1).weight squeezed)
    # o_ref    : (1, C, 1)    f32  -- attention weights for this batch element
    # sum_acc  : (C, 1) VMEM scratch -- running per-channel sum over spatial tiles
    # max_acc  : (C, 1) VMEM scratch -- running per-channel max over spatial tiles
    s = pl.program_id(1)
    last_s = pl.num_programs(1) - 1

    xb = x_ref[0]                                           # (C, TS), spatial on lanes
    tile_sum = jnp.sum(xb, axis=1, keepdims=True)           # (C, 1)  lane reduction (XLU)
    tile_max = jnp.max(xb, axis=1, keepdims=True)           # (C, 1)

    @pl.when(s == 0)
    def _():
        sum_acc[...] = jnp.zeros_like(sum_acc)
        max_acc[...] = jnp.full_like(max_acc, -jnp.inf)

    sum_acc[...] = sum_acc[...] + tile_sum
    max_acc[...] = jnp.maximum(max_acc[...], tile_max)

    @pl.when(s == last_s)
    def _():
        avg = sum_acc[...] * inv_hw                          # (C, 1)
        mx = max_acc[...]                                    # (C, 1)
        w1t = w1t_ref[...]                                   # (C, Cmid)
        w2 = w2_ref[...]                                     # (C, Cmid)

        # h_a[m] = sum_c W1[m,c] * avg[c]  (lane-broadcast of avg, sublane reduce)
        h_a = jnp.sum(w1t * avg, axis=0, keepdims=True)      # (1, Cmid)
        h_m = jnp.sum(w1t * mx, axis=0, keepdims=True)       # (1, Cmid)
        h = jnp.maximum(h_a, 0.0) + jnp.maximum(h_m, 0.0)    # relu each branch, then sum

        # y[c] = sum_m W2[c,m] * h[m]  (sublane-broadcast of h, lane reduce)
        y = jnp.sum(w2 * h, axis=1, keepdims=True)           # (C, 1)

        att = 1.0 / (1.0 + jnp.exp(-y))                      # sigmoid (EUP)
        o_ref[0] = att.astype(o_ref.dtype)


def channel_attention_pallas(x_nchw, w1_pt, w2_pt, *, spatial_tile=128):
    """x_nchw: (N, C, H, W) f32.
    w1_pt: (Cmid, C, 1, 1) -- Conv2d(C, Cmid, 1, bias=False).weight
    w2_pt: (C, Cmid, 1, 1) -- Conv2d(Cmid, C, 1, bias=False).weight
    Returns (N, C, 1, 1) attention weights."""
    N, C, H, W = x_nchw.shape
    Cmid = w1_pt.shape[0]
    HW = H * W

    # Spatial tiling: lane-dense tiles of size `spatial_tile`; fall back to the
    # full extent when it does not divide evenly (full-dim blocks are allowed).
    if spatial_tile > HW or HW % spatial_tile != 0:
        spatial_tile = HW
    n_spatial_tiles = HW // spatial_tile

    x_flat = x_nchw.reshape(N, C, HW)                        # NCHW kept; spatial -> lanes
    w1t = jnp.transpose(w1_pt[:, :, 0, 0], (1, 0))           # (C, Cmid)
    w2 = w2_pt[:, :, 0, 0]                                   # (C, Cmid)

    kernel = functools.partial(_channel_attention_kernel, inv_hw=1.0 / float(HW))
    vmem = pl.BlockSpec(memory_space=pltpu.MemorySpace.VMEM)

    out = pl.pallas_call(
        kernel,
        out_shape=jax.ShapeDtypeStruct((N, C, 1), jnp.float32),
        grid_spec=pltpu.PrefetchScalarGridSpec(
            num_scalar_prefetch=0,
            grid=(N, n_spatial_tiles),
            in_specs=[
                pl.BlockSpec((1, C, spatial_tile), lambda n, s: (n, 0, s)),
                vmem,   # w1t: small, whole array resident in VMEM
                vmem,   # w2
            ],
            out_specs=pl.BlockSpec((1, C, 1), lambda n, s: (n, 0, 0)),
            scratch_shapes=[
                pltpu.VMEM((C, 1), jnp.float32),   # per-channel sum accumulator
                pltpu.VMEM((C, 1), jnp.float32),   # per-channel max accumulator
            ],
        ),
        compiler_params=pltpu.CompilerParams(
            dimension_semantics=("parallel", "arbitrary"),
        ),
    )(x_flat, w1t, w2)

    return out.reshape(N, C, 1, 1)


# ----------------------------- pure-JAX reference -----------------------------
def channel_attention_ref(x, w1_pt, w2_pt):
    N, C, H, W = x.shape
    w1 = w1_pt[:, :, 0, 0]                                   # (Cmid, C)
    w2 = w2_pt[:, :, 0, 0]                                   # (C, Cmid)
    avg = jnp.mean(x, axis=(2, 3))                           # (N, C)
    mx = jnp.max(x, axis=(2, 3))                             # (N, C)

    def mlp(p):
        h = jnp.maximum(p @ w1.T, 0.0)                       # (N, Cmid)
        return h @ w2.T                                      # (N, C)

    out = jax.nn.sigmoid(mlp(avg) + mlp(mx))                 # (N, C)
    return out[:, :, None, None]


if __name__ == "__main__":
    # in_planes=32, ratio=16 (module default) -> hidden = 2
    N, C, H, W, ratio = 2, 32, 16, 16, 16
    Cmid = C // ratio

    key = jax.random.PRNGKey(0)
    kx, k1, k2 = jax.random.split(key, 3)
    x = jax.random.normal(kx, (N, C, H, W), jnp.float32)
    w1_pt = 0.2 * jax.random.normal(k1, (Cmid, C, 1, 1), jnp.float32)
    w2_pt = 0.2 * jax.random.normal(k2, (C, Cmid, 1, 1), jnp.float32)

    out_pallas = jax.block_until_ready(channel_attention_pallas(x, w1_pt, w2_pt))
    out_ref = channel_attention_ref(x, w1_pt, w2_pt)

    assert out_pallas.shape == (N, C, 1, 1)
    max_err = float(jnp.max(jnp.abs(out_pallas - out_ref)))
    assert max_err < 1e-5, f"mismatch vs reference: {max_err}"
    print("KERNEL_OK")
</pallas_src>

<mosaic_0001>
module attributes {stable_mosaic.version = 11 : i64} {
  func.func @_channel_attention_kernel(%arg0: i32, %arg1: i32, %arg2: memref<1x32x128xf32, #tpu.memory_space<vmem>>, %arg3: memref<32x2xf32, #tpu.memory_space<vmem>>, %arg4: memref<32x2xf32, #tpu.memory_space<vmem>>, %arg5: memref<1x32x1xf32, #tpu.memory_space<vmem>>, %arg6: memref<32x1xf32, #tpu.memory_space<vmem>>, %arg7: memref<32x1xf32, #tpu.memory_space<vmem>>) attributes {dimension_semantics = [#tpu.dimension_semantics<parallel>, #tpu.dimension_semantics<arbitrary>], iteration_bounds = array<i64: 2, 2>, scalar_prefetch = 0 : i64, scratch_operands = 2 : i64, tpu.core_type = #tpu.core_type<tc>, window_params = [{transform_indices = @transform_0, window_bounds = array<i64: 1, 32, 128>}, {pipeline_mode = #tpu.pipeline_mode<synchronous>, transform_indices = @transform_1, window_bounds = array<i64: 32, 2>}, {pipeline_mode = #tpu.pipeline_mode<synchronous>, transform_indices = @transform_2, window_bounds = array<i64: 32, 2>}, {transform_indices = @transform_3, window_bounds = array<i64: 1, 32, 1>}]} {
    %c0 = arith.constant 0 : index
    %c0_0 = arith.constant 0 : index
    %c0_1 = arith.constant 0 : index
    %0 = vector.load %arg2[%c0, %c0_0, %c0_1] : memref<1x32x128xf32, #tpu.memory_space<vmem>>, vector<1x32x128xf32>
    %1 = vector.shape_cast %0 : vector<1x32x128xf32> to vector<32x128xf32>
    %cst = arith.constant dense<0.000000e+00> : vector<32xf32>
    %2 = vector.multi_reduction <add>, %1, %cst [1] : vector<32x128xf32> to vector<32xf32>
    %3 = vector.shape_cast %2 : vector<32xf32> to vector<32x1xf32>
    %cst_2 = arith.constant dense<0xFF800000> : vector<32xf32>
    %4 = vector.multi_reduction <maximumf>, %1, %cst_2 [1] : vector<32x128xf32> to vector<32xf32>
    %5 = vector.shape_cast %4 : vector<32xf32> to vector<32x1xf32>
    %c0_i32 = arith.constant 0 : i32
    %6 = arith.cmpi eq, %arg1, %c0_i32 : i32
    %7 = arith.extui %6 : i1 to i32
    %c0_i32_3 = arith.constant 0 : i32
    %8 = arith.cmpi ne, %7, %c0_i32_3 : i32
    scf.if %8 {
      %cst_13 = arith.constant 0.000000e+00 : f32
      %18 = vector.broadcast %cst_13 : f32 to vector<32x1xf32>
      %c0_14 = arith.constant 0 : index
      %c0_15 = arith.constant 0 : index
      %19 = vector.load %arg6[%c0_14, %c0_15] : memref<32x1xf32, #tpu.memory_space<vmem>>, vector<32x1xf32>
      tpu.vector_store %arg6[%c0_14, %c0_15], %18 {strides = array<i32>} : memref<32x1xf32, #tpu.memory_space<vmem>>, vector<32x1xf32>,
      %cst_16 = arith.constant 0xFF800000 : f32
      %20 = vector.broadcast %cst_16 : f32 to vector<32x1xf32>
      %c0_17 = arith.constant 0 : index
      %c0_18 = arith.constant 0 : index
      %21 = vector.load %arg7[%c0_17, %c0_18] : memref<32x1xf32, #tpu.memory_space<vmem>>, vector<32x1xf32>
      tpu.vector_store %arg7[%c0_17, %c0_18], %20 {strides = array<i32>} : memref<32x1xf32, #tpu.memory_space<vmem>>, vector<32x1xf32>,
    } else {
    }
    %c0_4 = arith.constant 0 : index
    %c0_5 = arith.constant 0 : index
    %9 = vector.load %arg6[%c0_4, %c0_5] : memref<32x1xf32, #tpu.memory_space<vmem>>, vector<32x1xf32>
    %10 = arith.addf %9, %3 : vector<32x1xf32>
    %c0_6 = arith.constant 0 : index
    %c0_7 = arith.constant 0 : index
    %11 = vector.load %arg6[%c0_6, %c0_7] : memref<32x1xf32, #tpu.memory_space<vmem>>, vector<32x1xf32>
    tpu.vector_store %arg6[%c0_6, %c0_7], %10 {strides = array<i32>} : memref<32x1xf32, #tpu.memory_space<vmem>>, vector<32x1xf32>,
    %c0_8 = arith.constant 0 : index
    %c0_9 = arith.constant 0 : index
    %12 = vector.load %arg7[%c0_8, %c0_9] : memref<32x1xf32, #tpu.memory_space<vmem>>, vector<32x1xf32>
    %13 = arith.maximumf %12, %5 : vector<32x1xf32>
    %c0_10 = arith.constant 0 : index
    %c0_11 = arith.constant 0 : index
    %14 = vector.load %arg7[%c0_10, %c0_11] : memref<32x1xf32, #tpu.memory_space<vmem>>, vector<32x1xf32>
    tpu.vector_store %arg7[%c0_10, %c0_11], %13 {strides = array<i32>} : memref<32x1xf32, #tpu.memory_space<vmem>>, vector<32x1xf32>,
    %c1_i32 = arith.constant 1 : i32
    %15 = arith.cmpi eq, %arg1, %c1_i32 : i32
    %16 = arith.extui %15 : i1 to i32
    %c0_i32_12 = arith.constant 0 : i32
    %17 = arith.cmpi ne, %16, %c0_i32_12 : i32
    scf.if %17 {
      %c0_13 = arith.constant 0 : index
      %c0_14 = arith.constant 0 : index
      %18 = vector.load %arg6[%c0_13, %c0_14] : memref<32x1xf32, #tpu.memory_space<vmem>>, vector<32x1xf32>
      %cst_15 = arith.constant 3.906250e-03 : f32
      %19 = vector.broadcast %cst_15 : f32 to vector<32x1xf32>
      %20 = arith.mulf %18, %19 : vector<32x1xf32>
      %c0_16 = arith.constant 0 : index
      %c0_17 = arith.constant 0 : index
      %21 = vector.load %arg7[%c0_16, %c0_17] : memref<32x1xf32, #tpu.memory_space<vmem>>, vector<32x1xf32>
      %c0_18 = arith.constant 0 : index
      %c0_19 = arith.constant 0 : index
      %22 = vector.load %arg3[%c0_18, %c0_19] : memref<32x2xf32, #tpu.memory_space<vmem>>, vector<32x2xf32>
      %c0_20 = arith.constant 0 : index
      %c0_21 = arith.constant 0 : index
      %23 = vector.load %arg4[%c0_20, %c0_21] : memref<32x2xf32, #tpu.memory_space<vmem>>, vector<32x2xf32>
      %24 = vector.broadcast %20 : vector<32x1xf32> to vector<32x2xf32>
      %25 = arith.mulf %22, %24 : vector<32x2xf32>
      %cst_22 = arith.constant dense<0.000000e+00> : vector<2xf32>
      %26 = vector.multi_reduction <add>, %25, %cst_22 [0] : vector<32x2xf32> to vector<2xf32>
      %27 = vector.shape_cast %26 : vector<2xf32> to vector<1x2xf32>
      %28 = vector.broadcast %21 : vector<32x1xf32> to vector<32x2xf32>
      %29 = arith.mulf %22, %28 : vector<32x2xf32>
      %cst_23 = arith.constant dense<0.000000e+00> : vector<2xf32>
      %30 = vector.multi_reduction <add>, %29, %cst_23 [0] : vector<32x2xf32> to vector<2xf32>
      %31 = vector.shape_cast %30 : vector<2xf32> to vector<1x2xf32>
      %cst_24 = arith.constant 0.000000e+00 : f32
      %32 = vector.broadcast %cst_24 : f32 to vector<1x2xf32>
      %33 = arith.maximumf %27, %32 : vector<1x2xf32>
      %cst_25 = arith.constant 0.000000e+00 : f32
      %34 = vector.broadcast %cst_25 : f32 to vector<1x2xf32>
      %35 = arith.maximumf %31, %34 : vector<1x2xf32>
      %36 = arith.addf %33, %35 : vector<1x2xf32>
      %37 = vector.broadcast %36 : vector<1x2xf32> to vector<32x2xf32>
      %38 = arith.mulf %23, %37 : vector<32x2xf32>
      %cst_26 = arith.constant dense<0.000000e+00> : vector<32xf32>
      %39 = vector.multi_reduction <add>, %38, %cst_26 [1] : vector<32x2xf32> to vector<32xf32>
      %40 = vector.shape_cast %39 : vector<32xf32> to vector<32x1xf32>
      %cst_27 = arith.constant 0.000000e+00 : f32
      %41 = vector.broadcast %cst_27 : f32 to vector<32x1xf32>
      %42 = arith.subf %41, %40 : vector<32x1xf32>
      %43 = math.exp %42 : vector<32x1xf32>
      %cst_28 = arith.constant 1.000000e+00 : f32
      %44 = vector.broadcast %cst_28 : f32 to vector<32x1xf32>
      %45 = arith.addf %44, %43 : vector<32x1xf32>
      %cst_29 = arith.constant 1.000000e+00 : f32
      %46 = vector.broadcast %cst_29 : f32 to vector<32x1xf32>
      %47 = arith.divf %46, %45 : vector<32x1xf32>
      %c0_30 = arith.constant 0 : index
      %c0_31 = arith.constant 0 : index
      %c0_32 = arith.constant 0 : index
      %48 = vector.load %arg5[%c0_30, %c0_31, %c0_32] : memref<1x32x1xf32, #tpu.memory_space<vmem>>, vector<1x32x1xf32>
      %49 = vector.shape_cast %48 : vector<1x32x1xf32> to vector<32x1xf32>
      %50 = vector.shape_cast %47 : vector<32x1xf32> to vector<1x32x1xf32>
      tpu.vector_store %arg5[%c0_30, %c0_31, %c0_32], %50 {strides = array<i32>} : memref<1x32x1xf32, #tpu.memory_space<vmem>>, vector<1x32x1xf32>,
    } else {
    }
    return
  }
  func.func @transform_0(%arg0: i32, %arg1: i32) -> (i32, i32, i32) {
    %c0_i32 = arith.constant 0 : i32
    %c0_i32_0 = arith.constant 0 : i32
    return %arg0, %c0_i32, %arg1 : i32, i32, i32
  }
  func.func @transform_1(%arg0: i32, %arg1: i32) -> (i32, i32) {
    %c0_i32 = arith.constant 0 : i32
    %c0_i32_0 = arith.constant 0 : i32
    %c0_i32_1 = arith.constant 0 : i32
    return %c0_i32, %c0_i32_0 : i32, i32
  }
  func.func @transform_2(%arg0: i32, %arg1: i32) -> (i32, i32) {
    %c0_i32 = arith.constant 0 : i32
    %c0_i32_0 = arith.constant 0 : i32
    %c0_i32_1 = arith.constant 0 : i32
    return %c0_i32, %c0_i32_0 : i32, i32
  }
  func.func @transform_3(%arg0: i32, %arg1: i32) -> (i32, i32, i32) {
    %c0_i32 = arith.constant 0 : i32
    %c0_i32_0 = arith.constant 0 : i32
    %c0_i32_1 = arith.constant 0 : i32
    return %arg0, %c0_i32, %c0_i32_0 : i32, i32, i32
  }
}

</mosaic_0001>

<bundles_post_ra>
// kernel: tpu_custom_call.1
= control target key start
LH: loop header
LB: loop body
LE: loop exit
PB: predicated region body
PF: predicated region fallthrough
CT: control target
= control target key end

     0   :  { %8 = vsyncpa [#allocation5], 0  ;;  %s949_s0 = inlined_call_operand.hbm [shape: f32[2,32,256], index: 0, kind: input, shape index: {}]   ;;  %s950_s1 = inlined_call_operand.vmem [shape: f32[32,2], index: 1, kind: input, shape index: {}]   ;;  %s951_s2 = inlined_call_operand.vmem [shape: f32[32,2], index: 2, kind: input, shape index: {}]   ;;  %s952_s3 = inlined_call_operand.vmem [shape: f32[2,32,1], index: 3, kind: output, shape index: {}]  }
   0x1   :  { %10 = vsyncpa [#allocation5 + $0x1], 0  ;;  %s780_s12 = smov 0   ;;  %s782_s13 = smov 0  }
   0x2   :  { %s784_s14 = smov 0   ;;  %s786_s15 = smov 0  }
   0x3   :  { %s788_s16 = smov 0   ;;  %s790_s17 = smov 0  }
   0x4   :  { %s792_s18 = smov 0   ;;  %s794_s19 = smov 0  }
   0x5 LB: > { %s544_s20 = sadd.s32 4294967295, %s752_s19   ;;  %s25_s21 = sadd.s32 1, %s744_s17  ;;  %s752_s19 = sphi %s794_s19, %s16_s19   ;;  %s748_s18 = sphi %s792_s18, %s961_s18   ;;  %s744_s17 = sphi %s790_s17, %s960_s17   ;;  %s740_s16 = sphi %s788_s16, %s959_s16   ;;  %s736_s15 = sphi %s786_s15, %s958_s15   ;;  %s732_s14 = sphi %s784_s14, %s957_s14   ;;  %s728_s13 = sphi %s782_s13, %s956_s13   ;;  %s724_s12 = sphi %s780_s12, %s955_s12  }
   0x6   : > { %p26_p0 = scmp.ge.s32.totalorder %s25_s21, 2  ;;  %s28_s22 = sadd.s32 1, %s748_s18 }
   0x7   : > { %s37_s23 = sadd.s32 1, %s732_s14  ;;  %p44_p1 = scmp.ne.s32.totalorder %s732_s14, %s728_s13 }
   0x8   : > { %s963_s21 = smov (%p26_p0, %s25_s21), 0  ;;  %s965_s22 = smov (!%p26_p0, %s28_s22), %s748_s18 }
   0x9   : > { %s33_s24 = ssub.s32 %s744_s17, %s963_s21  ;;  %p45_p2 = scmp.eq.s32.totalorder %s752_s19, 0 }
   0xa   : > { %p30_p3 = scmp.ge.s32.totalorder %s965_s22, 2  ;;  %p50_p4 = scmp.ne.s32.totalorder %s728_s13, %s724_s12 }
   0xb   : > { %p831_p5 = por %p45_p2, %p44_p1  ;;  %p51_p6 = scmp.eq.s32.totalorder %s544_s20, 0 }
   0xc   : > { %s967_s22 = smov (%p30_p3, %s965_s22), 0  ;;  %p566_p8 = scmp.lt.s32.totalorder %s752_s19, 4 }
   0xd   : > { %p837_p7 = por %p51_p6, %p50_p4  ;;  %s32_s27 = ssub.s32 %s748_s18, %s967_s22 }
   0xe   : > { %s34_s28 = sor.u32 %s33_s24, %s32_s27  ;;  %s148_s29 = sand.u32 1, %s732_s14  }
   0xf   : > { %p35_p9 = scmp.eq.s32.totalorder %s34_s28, 0  ;;  %s548_s30 = sshll.u32 %s148_s29, 5 }
  0x10   : > { %s549_s4 = sshll.u32 %s748_s18, 3  ;;  %s152_s8 = scalar_lea.vmem [#allocation4], %s548_s30 }
  0x11   : > { %s847_s5 = scalar_select %p35_p9, %s732_s14, %s37_s23  }
  0x12   : > { %s156_s6 = sadd.s32 %s744_s17, %s549_s4  ;;  %s161_s9 = sshll.u32 %s152_s8, 4  ;;  %s162_s9 = int_to_ptr.vmem [resolvable:$true] %s161_s9 }
  0x13   : > { %s550_s7 = sshll.u32 %s156_s6, 3  ;;  %p563_p10 = pnand %p566_p8, %p831_p5 }
  0x14   : > { %s158_s12 = scalar_lea.hbm %s949_s0, %s550_s7  ;;  %p551_p11 = scmp.ge.s32.totalorder %s752_s19, 1 }
  0x15   : > { %s159_s20 = sshll.u32 %s158_s12, 4  ;;  %s149_s24 = scalar_lea.sflag [#allocation5], %s148_s29  ;;  %s160_s20 = int_to_ptr.hbm [resolvable:$true] %s159_s20 }
  0x16   : > { %s754_s27 = smov 256   ;;  %s755_s23 = smov 128  }
  0x17   : > { %s756_s28 = smov 8   ;;  %p169_p12 = scmp.lt.s32.totalorder %s752_s19, 5 }
  0x18   : > { %565 = dma.hbm_to_vmem [thread:$0]  (!%p563_p10), %s160_s20, 512, %s162_s9, %s149_s24, %s754_s27, %s755_s23, %s756_s28  }
  0x19   : > { %p170_p13 = pnand %p551_p11, %p169_p12 }
  0x1a   : > { %s175_s30 = sand.u32 (!%p170_p13), 1, %s728_s13  }
  0x1b   : > { %173 = sbr.rel (%p170_p13) target bundleno = 503 (0x1f7), region = 32  ;;  %s552_s4 = sshll.u32 (!%p170_p13), %s175_s30, 5 }
  0x1c   : > { %s176_s6 = scalar_lea.sflag (!%p170_p13), [#allocation5], %s175_s30  ;;  %s179_s7 = scalar_lea.vmem (!%p170_p13), [#allocation4], %s552_s4 }
  0x20   : > { %719 = dma.done.wait (%p837_p7), %s176_s6, 512  }
  0x21   : > { %721 = vsyncadd (%p837_p7), %s176_s6, 4294966784  ;;  %p203_p0 = scmp.lt.s32.totalorder %s740_s16, 1  ;;  %v210_v0 = vld [vmem:[%s179_s7 + $0x10] sm:$0xff]  ;;  %v208_v1 = vld [vmem:[%s179_s7] sm:$0xff]  ;;  %p555_p1 = scmp.ne.s32.totalorder %s736_s15, 0 }
  0x22   : > { %216 = vadd.xlane.f32.xlu1 %v210_v0  ;;  %212 = vadd.xlane.f32.xlu0 %v208_v1  ;;  %v211_v2 = vld [vmem:[%s179_s7 + $0x18] sm:$0xff]  ;;  %v209_v3 = vld [vmem:[%s179_s7 + $0x8] sm:$0xff] }
  0x23   : > { %s969_s16 = smov (!%p203_p0, %s740_s16), 1  ;;  %220 = vmax.xlane.f32.xlu2 %v208_v1 }
  0x24   : > { %s559_s25 = sshll.u32 %s969_s16, 5 }
  0x25   : > { %s869_s9 = scalar_lea.vmem %s952_s3, %s559_s25 }
  0x2a   : > { %218 = vadd.xlane.f32.xlu1 %v211_v2  ;;  %214 = vadd.xlane.f32.xlu0 %v209_v3 }
  0x2b   : > { %222 = vmax.xlane.f32.xlu2 %v209_v3 }
  0x32   : > { %226 = vmax.xlane.f32.xlu1 %v211_v2  ;;  %224 = vmax.xlane.f32.xlu0 %v210_v0 }
  0x95   : > { %v217_v4 = vpop.xlane.xlu1 %216  ;;  %v213_v5 = vpop.xlane.xlu0 %212 }
  0x96   : > { %v221_v6 = vpop.xlane.xlu2 %220 }
  0x9d   : > { %v219_v7 = vpop.xlane.xlu1 %218  ;;  %v215_v8 = vpop.xlane.xlu0 %214 }
  0x9e   : > { %v223_v9 = vpop.xlane.xlu2 %222 }
  0xa1   : > { %231 = sbr.rel (%p555_p1) target bundleno = 175 (0xaf), region = 40 }
  0xa5   : > { %v227_v10 = vpop.xlane.xlu1 %226  ;;  %v225_v11 = vpop.xlane.xlu0 %224 }
  0xa6   : > { %vm232_vm0 = vcmask 7168   ;;  %v757_v12 = vmov 0.0   ;;  %v758_v13 = vmov -inf  }
  0xa7   : > { %233 = vst.msk [vmem:[#allocation2] sm:$0xff] %vm232_vm0, %v757_v12 }
  0xa8   : > { %234 = vst.msk [vmem:[#allocation2 + $0x8] sm:$0xff] %vm232_vm0, %v757_v12 }
  0xa9   : > { %235 = vst.msk [vmem:[#allocation2 + $0x10] sm:$0xff] %vm232_vm0, %v757_v12 }
  0xaa   : > { %236 = vst.msk [vmem:[#allocation2 + $0x18] sm:$0xff] %vm232_vm0, %v757_v12 }
  0xab   : > { %237 = vst.msk [vmem:[#allocation3] sm:$0xff] %vm232_vm0, %v758_v13 }
  0xac   : > { %238 = vst.msk [vmem:[#allocation3 + $0x8] sm:$0xff] %vm232_vm0, %v758_v13 }
  0xad   : > { %239 = vst.msk [vmem:[#allocation3 + $0x10] sm:$0xff] %vm232_vm0, %v758_v13 }
  0xae   : > { %240 = vst.msk [vmem:[#allocation3 + $0x18] sm:$0xff] %vm232_vm0, %v758_v13 }
  0xaf PF: > { %v241_v14 = vld [vmem:[#allocation2] sm:$0xff]  ;;  %vm249_vm1 = vcmask 7168   ;;  %v242_v15 = vld [vmem:[#allocation2 + $0x8] sm:$0xff]  ;;  %p556_p2 = scmp.ne.s32.totalorder %s736_s15, 1 }
  0xb0   : > { %v243_v16 = vld [vmem:[#allocation2 + $0x10] sm:$0xff]  ;;  %v245_v17 = vadd.f32 %v241_v14, %v213_v5  ;;  %v246_v18 = vadd.f32 %v242_v15, %v215_v8 }
  0xb1   : > { %v247_v19 = vadd.f32 %v243_v16, %v217_v4  ;;  %v244_v20 = vld [vmem:[#allocation2 + $0x18] sm:$0xff] }
  0xb2   : > { %v254_v21 = vld [vmem:[#allocation3] sm:$0xff]  ;;  %v248_v23 = vadd.f32 %v244_v20, %v219_v7  ;;  %250 = vst.msk [vmem:[#allocation2] sm:$0xff] %vm249_vm1, %v245_v17 }
  0xb3   : > { %v255_v22 = vld [vmem:[#allocation3 + $0x8] sm:$0xff]  ;;  %v258_v25 = vmax.f32 %v254_v21, %v221_v6  ;;  %251 = vst.msk [vmem:[#allocation2 + $0x8] sm:$0xff] %vm249_vm1, %v246_v18 }
  0xb4   : > { %v256_v24 = vld [vmem:[#allocation3 + $0x10] sm:$0xff]  ;;  %v259_v27 = vmax.f32 %v255_v22, %v223_v9  ;;  %252 = vst.msk [vmem:[#allocation2 + $0x10] sm:$0xff] %vm249_vm1, %v247_v19 }
  0xb5   : > { %v257_v26 = vld [vmem:[#allocation3 + $0x18] sm:$0xff]  ;;  %v260_v28 = vmax.f32 %v256_v24, %v225_v11  ;;  %253 = vst.msk [vmem:[#allocation2 + $0x18] sm:$0xff] %vm249_vm1, %v248_v23  ;;  %269 = sbr.rel (%p556_p2) target bundleno = 503 (0x1f7), region = 44 }
  0xb6   : > { %v261_v29 = vmax.f32 %v257_v26, %v227_v10  ;;  %262 = vst.msk [vmem:[#allocation3] sm:$0xff] %vm249_vm1, %v258_v25 }
  0xb7   : > { %263 = vst.msk [vmem:[#allocation3 + $0x8] sm:$0xff] %vm249_vm1, %v259_v27 }
  0xb8   : > { %264 = vst.msk [vmem:[#allocation3 + $0x10] sm:$0xff] %vm249_vm1, %v260_v28 }
  0xb9   : > { %265 = vst.msk [vmem:[#allocation3 + $0x18] sm:$0xff] %vm249_vm1, %v261_v29 }
  0xba   : > { %v270_v31 = vld [vmem:[#allocation2] sm:$0xff]  ;;  %v759_v32 = vmov 0   ;;  %v271_v36 = vld [vmem:[#allocation2 + $0x8] sm:$0xff]  ;;  %v284_v52 = vld [vmem:[%s950_s1 + $0x10] sm:$0xff]  ;;  %vm314_vm2 = vcmask 15360  }
  0xbb   : > { %638 = vset.pattern.permute.xlu1 %v759_v32  ;;  %637 = vset.pattern.permute.xlu0 %v759_v32  ;;  %v274_v33 = vmul.f32 0.00390625, %v270_v31  ;;  %v272_v34 = vld [vmem:[#allocation2 + $0x10] sm:$0xff]  ;;  %v275_v38 = vmul.f32 0.00390625, %v271_v36  ;;  %v282_v46 = vld [vmem:[%s950_s1] sm:$0xff]  ;;  %v283_v47 = vld [vmem:[%s950_s1 + $0x8] sm:$0xff] }
  0xbc   : > { %639 = vset.pattern.permute.xlu2 %v759_v32  ;;  %v276_v35 = vmul.f32 0.00390625, %v272_v34  ;;  %v273_v40 = vld [vmem:[#allocation2 + $0x18] sm:$0xff]  ;;  %v288_v27 = vld [vmem:[%s951_s2 + $0x10] sm:$0xff]  ;;  %v287_v28 = vld [vmem:[%s951_s2 + $0x8] sm:$0xff] }
  0xbd   : > { %v278_v30 = vld [vmem:[#allocation3] sm:$0xff]  ;;  %292 = vperm.xlu0 %637, %v274_v33   ;;  %v277_v42 = vmul.f32 0.00390625, %v273_v40  ;;  %v285_v63 = vld [vmem:[%s950_s1 + $0x18] sm:$0xff] }
  0xbe   : > { %330 = vperm.xlu1 %638, %v278_v30   ;;  %302 = vperm.xlu2 %639, %v276_v35   ;;  %v279_v37 = vld [vmem:[#allocation3 + $0x8] sm:$0xff]  ;;  %v286_v29 = vld [vmem:[%s951_s2] sm:$0xff] }
  0xbf   : > { %v280_v39 = vld [vmem:[#allocation3 + $0x10] sm:$0xff] }
  0xc0   : > { %v281_v41 = vld [vmem:[#allocation3 + $0x18] sm:$0xff] }
  0xc5   : > { %297 = vperm.xlu0 %637, %v275_v38  }
  0xc6   : > { %335 = vperm.xlu1 %638, %v279_v37   ;;  %340 = vperm.xlu2 %639, %v280_v39   ;;  %v289_v37 = vld [vmem:[%s951_s2 + $0x18] sm:$0xff] }
  0xcd   : > { %307 = vperm.xlu0 %637, %v277_v42  }
  0xce   : > { %345 = vperm.xlu1 %638, %v281_v41  }
 0x118   : > { %v303_v43 = vpop.permute.xlu2 %302 }
 0x119   : > { %v312_v60 = vmul.f32 %v303_v43, %v284_v52 }
 0x11b   : > { %v318_v5 = vsel %vm314_vm2, %v312_v60, 0.0 }
 0x120   : > { %v341_v54 = vpop.permute.xlu2 %340 }
 0x121   : > { %v350_v59 = vmul.f32 %v341_v54, %v284_v52 }
 0x123   : > { %v355_v2 = vsel %vm314_vm2, %v350_v59, 0.0 }
 0x12f   : > { %v293_v45 = vpop.permute.xlu0 %292 }
 0x130   : > { %v331_v44 = vpop.permute.xlu1 %330  ;;  %v310_v53 = vmul.f32 %v293_v45, %v282_v46 }
 0x131   : > { %v348_v49 = vmul.f32 %v331_v44, %v282_v46 }
 0x132   : > { %v315_v61 = vsel %vm314_vm2, %v310_v53, 0.0 }
 0x133   : > { %v352_v58 = vsel %vm314_vm2, %v348_v49, 0.0 }
 0x137   : > { %v298_v51 = vpop.permute.xlu0 %297 }
 0x138   : > { %v336_v48 = vpop.permute.xlu1 %335  ;;  %v311_v55 = vmul.f32 %v298_v51, %v283_v47 }
 0x139   : > { %v349_v50 = vmul.f32 %v336_v48, %v283_v47 }
 0x13a   : > { %v316_v57 = vsel %vm314_vm2, %v311_v55, 0.0 }
 0x13b   : > { %v353_v56 = vsel %vm314_vm2, %v349_v50, 0.0  ;;  %v317_v0 = vadd.f32 %v316_v57, %v315_v61 }
 0x13c   : > { %v354_v62 = vadd.f32 %v353_v56, %v352_v58 }
 0x13d   : > { %v319_v9 = vadd.f32 %v318_v5, %v317_v0 }
 0x13e   : > { %v356_v6 = vadd.f32 %v355_v2, %v354_v62 }
 0x13f   : > { %v308_v4 = vpop.permute.xlu0 %307 }
 0x140   : > { %v346_v1 = vpop.permute.xlu1 %345  ;;  %v313_v7 = vmul.f32 %v308_v4, %v285_v63 }
 0x141   : > { %v351_v3 = vmul.f32 %v346_v1, %v285_v63 }
 0x142   : > { %v320_v11 = vsel %vm314_vm2, %v313_v7, 0.0 }
 0x143   : > { %v357_v8 = vsel %vm314_vm2, %v351_v3, 0.0  ;;  %v321_v12 = vadd.f32 %v320_v11, %v319_v9 }
 0x144   : > { %v358_v10 = vadd.f32 %v357_v8, %v356_v6 }
 0x145   : > { %v322_v14 = vrot.slane %v321_v12, 4 }
 0x146   : > { %v359_v13 = vrot.slane %v358_v10, 4 }
 0x147   : > { %v323_v16 = vadd.f32 %v322_v14, %v321_v12 }
 0x148   : > { %v360_v15 = vadd.f32 %v359_v13, %v358_v10 }
 0x149   : > { %v324_v18 = vrot.slane %v323_v16, 2 }
 0x14a   : > { %v361_v17 = vrot.slane %v360_v15, 2 }
 0x14b   : > { %v325_v20 = vadd.f32 %v324_v18, %v323_v16 }
 0x14c   : > { %v362_v19 = vadd.f32 %v361_v17, %v360_v15 }
 0x14d   : > { %v326_v22 = vrot.slane %v325_v20, 1 }
 0x14e   : > { %v363_v21 = vrot.slane %v362_v19, 1 }
 0x14f   : > { %v327_v24 = vadd.f32 %v326_v22, %v325_v20 }
 0x150   : > { %v364_v23 = vadd.f32 %v363_v21, %v362_v19 }
 0x151   : > { %v365_v26 = vmax.f32 %v327_v24, 0.0 }
 0x152   : > { %v366_v25 = vmax.f32 %v364_v23, 0.0 }
 0x154   : > { %v367_v30 = vadd.f32 %v366_v25, %v365_v26 }
 0x156   : > { %v370_v31 = vmul.f32 %v367_v30, %v288_v27  ;;  %v369_v32 = vmul.f32 %v367_v30, %v287_v28  ;;  %v368_v33 = vmul.f32 %v367_v30, %v286_v29  ;;  %v371_v38 = vmul.f32 %v367_v30, %v289_v37 }
 0x158   : > { %v378_v34 = vsel %vm314_vm2, %v370_v31, 0.0  ;;  %v375_v35 = vsel %vm314_vm2, %v369_v32, 0.0  ;;  %v372_v36 = vsel %vm314_vm2, %v368_v33, 0.0  ;;  %v381_v39 = vsel %vm314_vm2, %v371_v38, 0.0 }
 0x159   : > { %379 = vadd.xlane.f32.xlu1 %v378_v34  ;;  %376 = vadd.xlane.f32.xlu0 %v375_v35 }
 0x15a   : > { %373 = vadd.xlane.f32.xlu2 %v372_v36 }
 0x162   : > { %382 = vadd.xlane.f32.xlu2 %v381_v39 }
 0x1cc   : > { %v380_v40 = vpop.xlane.xlu1 %379  ;;  %v377_v41 = vpop.xlane.xlu0 %376 }
 0x1cd   : > { %v386_v42 = vsub.f32 0.0, %v380_v40  ;;  %v385_v43 = vsub.f32 0.0, %v377_v41  ;;  %v374_v44 = vpop.xlane.xlu2 %373 }
 0x1ce   : > { %v384_v45 = vsub.f32 0.0, %v374_v44 }
 0x1cf   : > { %v392_v46 = vmul.f32 1.442695, %v386_v42  ;;  %v390_v47 = vmul.f32 1.442695, %v385_v43 }
 0x1d0   : > { %v388_v48 = vmul.f32 1.442695, %v384_v45 }
 0x1d1   : > { %640 = vpow2.f32 %v392_v46 }
 0x1d2   : > { %642 = vpow2.f32 %v390_v47 }
 0x1d3   : > { %644 = vpow2.f32 %v388_v48 }
 0x1d5   : > { %v383_v49 = vpop.xlane.xlu2 %382 }
 0x1d6   : > { %v387_v50 = vsub.f32 0.0, %v383_v49 }
 0x1d7   : > { %v641_v51 = vpop.eup %640 }
 0x1d8   : > { %v643_v52 = vpop.eup %642  ;;  %v398_v53 = vadd.f32 1.0, %v641_v51  ;;  %v394_v54 = vmul.f32 1.442695, %v387_v50 }
 0x1d9   : > { %v645_v55 = vpop.eup %644  ;;  %v397_v56 = vadd.f32 1.0, %v643_v52 }
 0x1da   : > { %646 = vrcp.f32 %v398_v53  ;;  %v396_v57 = vadd.f32 1.0, %v645_v55  ;;  %v439_v0 = vand.u32 2147483647, %v398_v53  ;;  %v441_v3 = vand.u32 2147483648, %v398_v53 }
 0x1db   : > { %648 = vrcp.f32 %v397_v56  ;;  %v426_v5 = vand.u32 2147483648, %v397_v56  ;;  %vm435_vm4 = vweird.f32 %v398_v53  ;;  %v424_v9 = vand.u32 2147483647, %v397_v56 }
 0x1dc   : > { %650 = vpow2.f32 %v394_v54  ;;  %vm440_vm6 = vcmp.eq.f32.partialorder %v439_v0, 8.507059e+37  ;;  %vm420_vm7 = vweird.f32 %v397_v56  ;;  %v442_v12 = vor.u32 1.1754944e-38, %v441_v3 }
 0x1dd   : > { %652 = vrcp.f32 %v396_v57  ;;  %v427_v14 = vor.u32 1.1754944e-38, %v426_v5  ;;  %v411_v15 = vand.u32 2147483648, %v396_v57  ;;  %v409_v18 = vand.u32 2147483647, %v396_v57 }
 0x1de   : > { %vm425_vm11 = vcmp.eq.f32.partialorder %v424_v9, 8.507059e+37  ;;  %vm405_vm12 = vweird.f32 %v396_v57 }
 0x1df   : > { %v412_v24 = vor.u32 1.1754944e-38, %v411_v15  ;;  %vm410_vm14 = vcmp.eq.f32.partialorder %v409_v18, 8.507059e+37 }
 0x1e0   : > { %v647_v58 = vpop.eup %646 }
 0x1e1   : > { %v649_v59 = vpop.eup %648  ;;  %v431_v60 = vmul.f32 %v647_v58, %v398_v53  ;;  %vm436_vm3 = vweird.f32 %v647_v58 }
 0x1e2   : > { %v651_v61 = vpop.eup %650  ;;  %v416_v62 = vmul.f32 %v649_v59, %v397_v56  ;;  %vm421_vm5 = vweird.f32 %v649_v59  ;;  %vm437_vm8 = vmor %vm435_vm4, %vm436_vm3 }
 0x1e3   : > { %v432_v63 = vsub.f32 1.0, %v431_v60  ;;  %v399_v1 = vadd.f32 1.0, %v651_v61  ;;  %v653_v2 = vpop.eup %652  ;;  %vm422_vm9 = vmor %vm420_vm7, %vm421_vm5 }
 0x1e4   : > { %v417_v4 = vsub.f32 1.0, %v416_v62  ;;  %v401_v7 = vmul.f32 %v653_v2, %v396_v57  ;;  %vm406_vm10 = vweird.f32 %v653_v2 }
 0x1e5   : > { %v433_v6 = vmul.f32 %v647_v58, %v432_v63  ;;  %654 = vrcp.f32 %v399_v1  ;;  %vm407_vm13 = vmor %vm405_vm12, %vm406_vm10  ;;  %v456_v29 = vand.u32 2147483648, %v399_v1  ;;  %v454_v31 = vand.u32 2147483647, %v399_v1 }
 0x1e6   : > { %v418_v8 = vmul.f32 %v649_v59, %v417_v4  ;;  %v402_v11 = vsub.f32 1.0, %v401_v7  ;;  %vm450_vm0 = vweird.f32 %v399_v1 }
 0x1e7   : > { %v434_v10 = vadd.f32 %v647_v58, %v433_v6  ;;  %v457_v33 = vor.u32 1.1754944e-38, %v456_v29  ;;  %vm455_vm3 = vcmp.eq.f32.partialorder %v454_v31, 8.507059e+37 }
 0x1e8   : > { %v419_v13 = vadd.f32 %v649_v59, %v418_v8  ;;  %v403_v17 = vmul.f32 %v653_v2, %v402_v11 }
 0x1e9   : > { %v438_v16 = vsel %vm437_vm8, %v647_v58, %v434_v10 }
 0x1ea   : > { %v443_v19 = vsel %vm440_vm6, %v442_v12, %v438_v16  ;;  %v423_v20 = vsel %vm422_vm9, %v649_v59, %v419_v13  ;;  %v404_v23 = vadd.f32 %v653_v2, %v403_v17 }
 0x1eb   : > { %v655_v21 = vpop.eup %654  ;;  %462 = vst.msk [vmem:[%s869_s9 + $0x10] sm:$0xff] %vm249_vm1, %v443_v19  ;;  %v428_v22 = vsel %vm425_vm11, %v427_v14, %v423_v20 }
 0x1ec   : > { %461 = vst.msk [vmem:[%s869_s9 + $0x8] sm:$0xff] %vm249_vm1, %v428_v22  ;;  %v446_v25 = vmul.f32 %v655_v21, %v399_v1  ;;  %v408_v26 = vsel %vm407_vm13, %v653_v2, %v404_v23  ;;  %vm451_vm15 = vweird.f32 %v655_v21 }
 0x1ed   : > { %v413_v27 = vsel %vm410_vm14, %v412_v24, %v408_v26  ;;  %vm452_vm2 = vmor %vm450_vm0, %vm451_vm15 }
 0x1ee   : > { %v447_v28 = vsub.f32 1.0, %v446_v25  ;;  %460 = vst.msk [vmem:[%s869_s9] sm:$0xff] %vm249_vm1, %v413_v27 }
 0x1f0   : > { %v448_v30 = vmul.f32 %v655_v21, %v447_v28 }
 0x1f2   : > { %v449_v32 = vadd.f32 %v655_v21, %v448_v30 }
 0x1f4   : > { %v453_v34 = vsel %vm452_vm2, %v655_v21, %v449_v32 }
 0x1f5   : > { %v458_v35 = vsel %vm455_vm3, %v457_v33, %v453_v34 }
 0x1f6   : > { %463 = vst.msk [vmem:[%s869_s9 + $0x18] sm:$0xff] %vm249_vm1, %v458_v35 }
 0x1f7 PF: > { %s16_s19 = sadd.s32 1, %s752_s19   ;;  %s955_s12 = smov %s728_s13 }
 0x1f8   : > { %p13_p3 = scmp.ge.s32.totalorder %s16_s19, 6   ;;  %s956_s13 = smov %s732_s14 }
 0x1f9   : > { %s957_s14 = smov %s847_s5  ;;  %s958_s15 = smov %s744_s17 }
 0x1fa   : > { %s959_s16 = smov %s748_s18  ;;  %s960_s17 = smov %s963_s21 }
 0x1fb   : > { %s961_s18 = smov %s967_s22  ;;  %15 = sbr.rel (!%p13_p3) target bundleno = 5 (0x5), region = 80 }
 0x200   :  { %485 = vsyncpa [#allocation5], 1 }
 0x201   :  { %487 = vsyncpa [#allocation5 + $0x1], 1 }

</bundles_post_ra>
